<compile_context>
chip_gen: v5e
topology: v5e:2x2
jax: 0.10.0
libtpu: 0.0.40
codegen_flags: <defaults>
</compile_context>

<pallas_src>
import functools

import jax
import jax.numpy as jnp
from jax.experimental import pallas as pl
from jax.experimental.pallas import tpu as pltpu

_LANE = 128
# ~2 MiB per input block -> 4x double-buffered (in+out) footprint = 8 MiB,
# safely under v5e's 16 MiB scoped-VMEM default and near the HBM-roofline
# plateau on v6e/v7x. Sweepable per generation via block_bytes.
_DEFAULT_BLOCK_BYTES = 2 * 1024 * 1024


def _swisht_b_kernel(beta_ref, x_ref, o_ref, *, alpha):
    # beta_ref: SMEM scalar-prefetch ref, shape (1,). x_ref/o_ref: (rb, 128) VMEM tiles.
    # Compute in f32 regardless of I/O dtype (v5e has no bf16 VPU/EUP path; the
    # casts are free in this memory-bound regime).
    beta = beta_ref[0].astype(jnp.float32)
    x = x_ref[...].astype(jnp.float32)
    # sigmoid(t) == 0.5 * (tanh(t/2) + 1): one EUP transcendental, no divide.
    z = 0.5 * (jnp.tanh((0.5 * beta) * x) + 1.0)
    o_ref[...] = (z * (x + 2.0 * alpha) - alpha).astype(o_ref.dtype)


def _block_rows(rows, itemsize, block_bytes):
    """Rows-per-block: dtype-aware sublane multiple, ~block_bytes per block,
    and >= 4 grid steps when the tensor is large enough."""
    pack = max(1, 4 // itemsize)          # 1 for f32, 2 for bf16, 4 for int8/fp8
    sub = 8 * pack                        # sublane multiple for the packed dtype
    target = max(sub, (block_bytes // (_LANE * itemsize) // sub) * sub)
    if rows < 4 * sub:
        return rows, 1                    # tiny tensor: one full-extent block
    quarter = max(sub, (rows // 4 // sub) * sub)   # guarantee >= 4 grid steps
    rb = min(target, quarter)
    return rb, pl.cdiv(rows, rb)


def _pallas_swisht_b_2d(x2d, beta_arr, alpha, block_bytes, donate_x):
    rows = x2d.shape[0]
    itemsize = jnp.dtype(x2d.dtype).itemsize
    rb, nblocks = _block_rows(rows, itemsize, block_bytes)
    n = rows * _LANE

    extra = {}
    if donate_x:
        # Caller guarantees x is dead after this call: reuse its HBM buffer.
        extra["input_output_aliases"] = {1: 0}

    return pl.pallas_call(
        functools.partial(_swisht_b_kernel, alpha=float(alpha)),
        out_shape=jax.ShapeDtypeStruct((rows, _LANE), x2d.dtype),
        grid_spec=pltpu.PrefetchScalarGridSpec(
            num_scalar_prefetch=1,        # beta lives in SMEM, prefetched once
            grid=(nblocks,),
            in_specs=[pl.BlockSpec((rb, _LANE), lambda i, beta_ref: (i, 0))],
            out_specs=pl.BlockSpec((rb, _LANE), lambda i, beta_ref: (i, 0)),
        ),
        compiler_params=pltpu.CompilerParams(
            dimension_semantics=("parallel",),
            vmem_limit_bytes=32 * 1024 * 1024,
        ),
        cost_estimate=pl.CostEstimate(
            flops=6 * n, transcendentals=n, bytes_accessed=2 * n * itemsize),
        **extra,
    )(beta_arr, x2d)


def swisht_b(x, beta, alpha=0.1, *, block_bytes=_DEFAULT_BLOCK_BYTES, donate_x=False):
    """Elementwise SwishT_B: sigmoid(beta*x) * (x + 2*alpha) - alpha.

    Call under jax.jit so the flatten/reshape views are layout bitcasts rather
    than materialized copies. `block_bytes` is sweepable (v7x can benefit from
    ~4 MiB; keep <= 2 MiB for v5e unless vmem_limit_bytes is raised).
    """
    orig_shape = x.shape
    dtype = x.dtype
    n = x.size
    if n == 0:
        return x

    beta_arr = jnp.asarray(beta, dtype=jnp.float32).reshape(1)
    alpha = float(alpha)

    flat = x.reshape(-1)                      # bitcast under jit (row-major)
    n_aligned = (n // _LANE) * _LANE

    if n_aligned == n:
        # Common case (NCHW conv activations): zero extra HBM passes.
        out2d = _pallas_swisht_b_2d(flat.reshape(-1, _LANE), beta_arr, alpha,
                                    block_bytes, donate_x)
        return out2d.reshape(orig_shape)

    # Ragged fallback: 128-aligned prefix through the kernel, <=127-element tail
    # as a trivial jnp epilogue (no full-tensor pad / slice passes).
    parts = []
    if n_aligned:
        prefix2d = flat[:n_aligned].reshape(-1, _LANE)
        out2d = _pallas_swisht_b_2d(prefix2d, beta_arr, alpha, block_bytes, False)
        parts.append(out2d.reshape(-1))
    tail = flat[n_aligned:].astype(jnp.float32)
    z = 0.5 * (jnp.tanh(0.5 * beta_arr[0] * tail) + 1.0)
    parts.append((z * (tail + 2.0 * alpha) - alpha).astype(dtype))
    out = jnp.concatenate(parts) if len(parts) > 1 else parts[0]
    return out.reshape(orig_shape)


if __name__ == "__main__":
    # Deterministic parameters per module __init__: beta = Parameter([1.5]), alpha = 0.1.
    beta_init = 1.5
    alpha = 0.1
    beta = jnp.asarray([beta_init], dtype=jnp.float32)

    def ref_fn(x):
        xf = x.astype(jnp.float32)
        return jax.nn.sigmoid(beta_init * xf) * (xf + 2.0 * alpha) - alpha

    fwd = jax.jit(lambda x, b: swisht_b(x, b, alpha=alpha))

    key = jax.random.PRNGKey(0)
    k1, k2, k3 = jax.random.split(key, 3)

    # 1) Primary NCHW case (lane-aligned), f32.
    x = jax.random.normal(k1, (2, 4, 16, 16), dtype=jnp.float32)
    y = jax.block_until_ready(fwd(x, beta))
    assert y.shape == x.shape and y.dtype == x.dtype
    assert jnp.max(jnp.abs(y - ref_fn(x))) < 1e-5

    # 2) bf16 I/O (f32 math inside the kernel).
    xb = x.astype(jnp.bfloat16)
    yb = jax.block_until_ready(fwd(xb, beta))
    assert yb.shape == xb.shape and yb.dtype == jnp.bfloat16
    assert jnp.max(jnp.abs(yb.astype(jnp.float32) - ref_fn(xb))) < 2e-2

    # 3) Multi-block grid with a masked partial trailing block (230 rows -> rb=56, 5 steps).
    xm = jax.random.normal(k2, (5, 23, 16, 16), dtype=jnp.float32)
    ym = jax.block_until_ready(fwd(xm, beta))
    assert ym.shape == xm.shape
    assert jnp.max(jnp.abs(ym - ref_fn(xm))) < 1e-5

    # 4) Ragged element count (not a multiple of 128): prefix kernel + jnp tail epilogue.
    xr = jax.random.normal(k3, (2, 3, 7, 11), dtype=jnp.float32)
    yr = jax.block_until_ready(fwd(xr, beta))
    assert yr.shape == xr.shape
    assert jnp.max(jnp.abs(yr - ref_fn(xr))) < 1e-5

    print("KERNEL_OK")
</pallas_src>

<mosaic_0001>
module attributes {stable_mosaic.version = 11 : i64} {
  func.func @_swisht_b_kernel(%arg0: i32, %arg1: memref<1xf32, #tpu.memory_space<smem>>, %arg2: memref<16x128xf32, #tpu.memory_space<vmem>>, %arg3: memref<16x128xf32, #tpu.memory_space<vmem>>) attributes {dimension_semantics = [#tpu.dimension_semantics<parallel>], iteration_bounds = array<i64: 1>, scalar_prefetch = 1 : i64, scratch_operands = 0 : i64, tpu.core_type = #tpu.core_type<tc>, window_params = [{transform_indices = @transform_0, window_bounds = array<i64: 16, 128>}, {transform_indices = @transform_1, window_bounds = array<i64: 16, 128>}]} {
    %c0 = arith.constant 0 : index
    %0 = memref.load %arg1[%c0] : memref<1xf32, #tpu.memory_space<smem>>
    %c0_0 = arith.constant 0 : index
    %c0_1 = arith.constant 0 : index
    %1 = vector.load %arg2[%c0_0, %c0_1] : memref<16x128xf32, #tpu.memory_space<vmem>>, vector<16x128xf32>
    %cst = arith.constant 5.000000e-01 : f32
    %2 = arith.mulf %cst, %0 : f32
    %3 = vector.broadcast %2 : f32 to vector<16x128xf32>
    %4 = arith.mulf %3, %1 : vector<16x128xf32>
    %5 = math.tanh %4 : vector<16x128xf32>
    %cst_2 = arith.constant 1.000000e+00 : f32
    %6 = vector.broadcast %cst_2 : f32 to vector<16x128xf32>
    %7 = arith.addf %5, %6 : vector<16x128xf32>
    %cst_3 = arith.constant 5.000000e-01 : f32
    %8 = vector.broadcast %cst_3 : f32 to vector<16x128xf32>
    %9 = arith.mulf %8, %7 : vector<16x128xf32>
    %cst_4 = arith.constant 2.000000e-01 : f32
    %10 = vector.broadcast %cst_4 : f32 to vector<16x128xf32>
    %11 = arith.addf %1, %10 : vector<16x128xf32>
    %12 = arith.mulf %9, %11 : vector<16x128xf32>
    %cst_5 = arith.constant 1.000000e-01 : f32
    %13 = vector.broadcast %cst_5 : f32 to vector<16x128xf32>
    %14 = arith.subf %12, %13 : vector<16x128xf32>
    %c0_6 = arith.constant 0 : index
    %c0_7 = arith.constant 0 : index
    %15 = vector.load %arg3[%c0_6, %c0_7] : memref<16x128xf32, #tpu.memory_space<vmem>>, vector<16x128xf32>
    tpu.vector_store %arg3[%c0_6, %c0_7], %14 {strides = array<i32>} : memref<16x128xf32, #tpu.memory_space<vmem>>, vector<16x128xf32>,
    return
  }
  func.func @transform_0(%arg0: i32, %arg1: memref<1xf32, #tpu.memory_space<smem>>) -> (i32, i32) {
    %c0_i32 = arith.constant 0 : i32
    %c0_i32_0 = arith.constant 0 : i32
    return %arg0, %c0_i32 : i32, i32
  }
  func.func @transform_1(%arg0: i32, %arg1: memref<1xf32, #tpu.memory_space<smem>>) -> (i32, i32) {
    %c0_i32 = arith.constant 0 : i32
    %c0_i32_0 = arith.constant 0 : i32
    return %arg0, %c0_i32 : i32, i32
  }
}

</mosaic_0001>

<bundles_post_ra>
// kernel: _lambda_.1
= control target key start
LH: loop header
LB: loop body
LE: loop exit
PB: predicated region body
PF: predicated region fallthrough
CT: control target
= control target key end

     0   :  { %s71_s0 = inlined_call_operand.<no memory space> [shape: f32[1], index: 0, kind: input, shape index: {}]   ;;  %s72_s1 = inlined_call_operand.vmem [shape: f32[16,128], index: 1, kind: input, shape index: {}]   ;;  %s73_s2 = inlined_call_operand.vmem [shape: f32[16,128], index: 2, kind: output, shape index: {}]  }
   0x1   :  { %v11_v0 = vld [vmem:[%s72_s1] sm:$0xff]  ;;  %s13_s13 = smul.f32 0.5, %s71_s0  ;;  %v12_v1 = vld [vmem:[%s72_s1 + $0x8] sm:$0xff] }
   0x2   :  { %v23_v8 = vadd.f32 0.2, %v11_v0  ;;  %v24_v10 = vadd.f32 0.2, %v12_v1 }
   0x3   :  { %v14_v2 = vstv %s13_s13 }
   0x4   :  { %v15_v3 = vmul.f32 %v14_v2, %v11_v0  ;;  %v16_v4 = vmul.f32 %v14_v2, %v12_v1 }
   0x6   :  { %37 = vtanh.f32 %v15_v3 }
   0x7   :  { %39 = vtanh.f32 %v16_v4 }
   0xc   :  { %v38_v5 = vpop.eup %37 }
   0xd   :  { %v40_v6 = vpop.eup %39  ;;  %v19_v7 = vadd.f32 1.0, %v38_v5 }
   0xe   :  { %v20_v9 = vadd.f32 1.0, %v40_v6 }
   0xf   :  { %v21_v11 = vmul.f32 0.5, %v19_v7 }
  0x10   :  { %v22_v12 = vmul.f32 0.5, %v20_v9 }
  0x11   :  { %v25_v13 = vmul.f32 %v23_v8, %v21_v11 }
  0x12   :  { %v26_v14 = vmul.f32 %v24_v10, %v22_v12 }
  0x13   :  { %v35_v15 = vadd.f32 -0.1, %v25_v13 }
  0x14   :  { %v36_v16 = vadd.f32 -0.1, %v26_v14 }
  0x15   :  { %29 = vst [vmem:[%s73_s2] sm:$0xff] %v35_v15 }
  0x16   :  { %30 = vst [vmem:[%s73_s2 + $0x8] sm:$0xff] %v36_v16 }

</bundles_post_ra>
